<compile_context>
chip_gen: v6e
topology: v6e:2x2x1
jax: 0.10.0
libtpu: 0.0.40
codegen_flags: <defaults>
</compile_context>

<pallas_src>
import functools

import jax
import jax.numpy as jnp
from jax.experimental import pallas as pl
from jax.experimental.pallas import tpu as pltpu


_HIDDEN_DIMS = (50, 250, 250, 50)        # fc1..fc4 logical output widths
_HIDDEN_PAD = (128, 256, 256, 128)       # lane-dense padded widths (bf16 tiles)
_LANE = 128
_TB_CAP = 1024                           # max batch rows per grid step
_SPLIT_MIN_B = 512                       # min batch to force 2-core splitting


def _round_up(x, m):
    return (x + m - 1) // m * m


def _num_tensorcores():
    """Best-effort TensorCores-per-device query (v7x has 2). Fallback: 1."""
    try:
        d = jax.devices()[0]
        n = int(getattr(d, "num_cores", 1))
        if n < 1:
            n = 1
        kind = str(getattr(d, "device_kind", "")).lower()
        if "v7" in kind:
            n = max(n, 2)
        return n
    except Exception:
        return 1


def _use_bf16_act():
    """bf16 bias-add/ReLU on v6e/v7x; keep f32 VPU path on v5e (no bf16 VALU)."""
    try:
        kind = str(jax.devices()[0].device_kind).lower()
    except Exception:
        return True
    return not ("v5e" in kind or "v5 lite" in kind or "v5lite" in kind)


def _choose_tiling(B, n_cores):
    """Returns (TB, B_padded, n_steps). TB is a multiple of 8."""
    B8 = _round_up(max(B, 1), 8)
    n_steps = max(1, pl.cdiv(B8, _TB_CAP))
    if n_cores >= 2 and B8 >= _SPLIT_MIN_B and n_steps % n_cores:
        # v7x: make the parallel batch axis feed both TensorCores.
        n_steps = _round_up(n_steps, n_cores)
    TB = _round_up(pl.cdiv(B8, n_steps), 8)
    B_p = TB * n_steps
    return TB, B_p, n_steps


def _mlp_kernel(x_ref,
                w1_ref, b1_ref,
                w2_ref, b2_ref,
                w3_ref, b3_ref,
                w4_ref, b4_ref,
                w5_ref, b5_ref,
                o_ref, *, act_bf16):
    """Fused (Linear+ReLU) x4 -> Linear.  bf16 MXU inputs, f32 accumulation."""
    h = x_ref[...].astype(jnp.bfloat16)          # f32 -> bf16 cast inside kernel

    def dense_relu(h_bf16, w_ref, b_ref):
        acc = jnp.dot(h_bf16, w_ref[...], preferred_element_type=jnp.float32)
        if act_bf16:
            # v6e/v7x: bias-add + ReLU in bf16 to halve vreg/spill pressure.
            pre = acc.astype(jnp.bfloat16) + b_ref[...].astype(jnp.bfloat16)
            return jnp.maximum(pre, 0)
        # v5e: f32 VPU path.
        return jnp.maximum(acc + b_ref[...], 0.0).astype(jnp.bfloat16)

    h = dense_relu(h, w1_ref, b1_ref)            # fc1 + relu1
    h = dense_relu(h, w2_ref, b2_ref)            # fc2 + relu2
    # dropout(p=0.5): identity in eval / inference mode.
    # TODO(synk): training-mode stochastic dropout (pltpu.prng_*) not applied.
    h = dense_relu(h, w3_ref, b3_ref)            # fc3 + relu3
    # dropout(p=0.5): identity in eval / inference mode.
    h = dense_relu(h, w4_ref, b4_ref)            # fc4 + relu4
    # fc5 (no activation); its out dim is pre-padded to 128 lanes.
    acc = jnp.dot(h, w5_ref[...], preferred_element_type=jnp.float32) + b5_ref[...]
    o_ref[...] = acc.astype(o_ref.dtype)


def prepare_params(params):
    """One-time parameter prep (hoisted out of the per-call path).

    Casts weights to bf16 and zero-pads every layer to lane/sublane-dense
    shapes (hidden 50->128, 250->256, output -> multiple of 128).  Padded
    columns have zero weight and zero bias, so padded activation lanes stay
    exactly zero through the whole chain and are sliced off at the end.
    Biases stay f32 (1, out) rows; kernel casts them to bf16 when needed.
    """
    input_dim = params["w1"].shape[0]
    output_dim = params["w5"].shape[1]
    out_p = _round_up(output_dim, _LANE)

    dims_in = (input_dim,) + _HIDDEN_DIMS
    dims_out = _HIDDEN_DIMS + (output_dim,)
    dims_in_p = (input_dim,) + _HIDDEN_PAD
    dims_out_p = _HIDDEN_PAD + (out_p,)

    prepared = []
    for li in range(5):
        w = params[f"w{li + 1}"]                       # (in, out)
        b = params[f"b{li + 1}"].reshape(1, -1)        # (1, out)
        pad_in = dims_in_p[li] - dims_in[li]
        pad_out = dims_out_p[li] - dims_out[li]
        w = jnp.pad(w, ((0, pad_in), (0, pad_out)))
        b = jnp.pad(b, ((0, 0), (0, pad_out)))
        prepared.append(w.astype(jnp.bfloat16))
        prepared.append(b.astype(jnp.float32))
    return tuple(jax.block_until_ready(p) for p in prepared)


@functools.partial(jax.jit, static_argnames=("output_dim",))
def ann_forward(x, prepared_params, *, output_dim):
    """x: (B, input_dim) f32; prepared_params from prepare_params()."""
    B, input_dim = x.shape
    out_p = _round_up(output_dim, _LANE)

    n_cores = _num_tensorcores()      # python-level, trace-time only
    act_bf16 = _use_bf16_act()
    TB, B_p, n_steps = _choose_tiling(B, n_cores)

    if B_p != B:
        x = jnp.pad(x, ((0, B_p - B), (0, 0)))

    def act_spec(feat):
        return pl.BlockSpec((TB, feat), lambda i: (i, 0))

    def resident_spec(shape):
        # Full-array block, constant index_map -> stays resident in VMEM.
        return pl.BlockSpec(shape, lambda i: (0, 0))

    in_specs = [act_spec(input_dim)]
    in_specs += [resident_spec(p.shape) for p in prepared_params]

    dims = (input_dim,) + _HIDDEN_PAD + (out_p,)
    flops = 2 * B_p * sum(dims[i] * dims[i + 1] for i in range(5))
    bytes_accessed = (
        sum(int(p.size) * p.dtype.itemsize for p in prepared_params)
        + B_p * input_dim * 4          # f32 x in
        + B_p * out_p * 2)             # bf16 out
    cost = pl.CostEstimate(flops=int(flops), transcendentals=0,
                           bytes_accessed=int(bytes_accessed))

    out_padded = pl.pallas_call(
        functools.partial(_mlp_kernel, act_bf16=act_bf16),
        out_shape=jax.ShapeDtypeStruct((B_p, out_p), jnp.bfloat16),
        grid_spec=pltpu.PrefetchScalarGridSpec(
            num_scalar_prefetch=0,
            grid=(n_steps,),
            in_specs=in_specs,
            out_specs=act_spec(out_p),
        ),
        compiler_params=pltpu.CompilerParams(
            dimension_semantics=("parallel",)),
        cost_estimate=cost,
    )(x, *prepared_params)

    # Slice off batch / lane padding; single fused slice+cast back to f32.
    return out_padded[:B, :output_dim].astype(jnp.float32)


def init_params(key, input_dim, output_dim):
    """Deterministic init mimicking PyTorch nn.Linear (uniform +-1/sqrt(fan_in)).

    Weights are stored transposed vs. PyTorch: (in_features, out_features).
    """
    dims = (input_dim,) + _HIDDEN_DIMS + (output_dim,)
    params = {}
    for li in range(5):
        fan_in, fan_out = dims[li], dims[li + 1]
        bound = 1.0 / (fan_in ** 0.5)
        key, kw, kb = jax.random.split(key, 3)
        params[f"w{li + 1}"] = jax.random.uniform(
            kw, (fan_in, fan_out), jnp.float32, -bound, bound)
        params[f"b{li + 1}"] = jax.random.uniform(
            kb, (fan_out,), jnp.float32, -bound, bound)
    return params


def ann_reference(x, params):
    """Plain-JAX f32 reference for correctness checking."""
    h = x
    for li in range(1, 5):
        h = jnp.maximum(h @ params[f"w{li}"] + params[f"b{li}"], 0.0)
    return h @ params["w5"] + params["b5"]


if __name__ == "__main__":
    key = jax.random.PRNGKey(0)
    input_dim, output_dim = 32, 4
    batch = 2

    k_params, k_x = jax.random.split(key)
    params = init_params(k_params, input_dim, output_dim)
    prepared = prepare_params(params)                    # one-time prep
    x = jax.random.normal(k_x, (batch, input_dim), jnp.float32)

    out = ann_forward(x, prepared, output_dim=output_dim)
    out = jax.block_until_ready(out)

    ref = ann_reference(x, params)
    assert out.shape == (batch, output_dim), out.shape
    # bf16 matmul inputs / activations -> loosened tolerance vs. f32 reference.
    assert jnp.allclose(out, ref, rtol=5e-2, atol=5e-2), (
        float(jnp.max(jnp.abs(out - ref))))

    # Also exercise the multi-step (pipelined) batch path with a ragged batch.
    k_x2 = jax.random.PRNGKey(1)
    x2 = jax.random.normal(k_x2, (2600, input_dim), jnp.float32)
    out2 = jax.block_until_ready(
        ann_forward(x2, prepared, output_dim=output_dim))
    ref2 = ann_reference(x2, params)
    assert out2.shape == (2600, output_dim), out2.shape
    assert jnp.allclose(out2, ref2, rtol=5e-2, atol=5e-2), (
        float(jnp.max(jnp.abs(out2 - ref2))))

    print("KERNEL_OK")
</pallas_src>

<mosaic_0001>
module attributes {stable_mosaic.version = 11 : i64} {
  func.func @_mlp_kernel(%arg0: i32, %arg1: memref<8x32xf32, #tpu.memory_space<vmem>>, %arg2: memref<32x128xbf16, #tpu.memory_space<vmem>>, %arg3: memref<1x128xf32, #tpu.memory_space<vmem>>, %arg4: memref<128x256xbf16, #tpu.memory_space<vmem>>, %arg5: memref<1x256xf32, #tpu.memory_space<vmem>>, %arg6: memref<256x256xbf16, #tpu.memory_space<vmem>>, %arg7: memref<1x256xf32, #tpu.memory_space<vmem>>, %arg8: memref<256x128xbf16, #tpu.memory_space<vmem>>, %arg9: memref<1x128xf32, #tpu.memory_space<vmem>>, %arg10: memref<128x128xbf16, #tpu.memory_space<vmem>>, %arg11: memref<1x128xf32, #tpu.memory_space<vmem>>, %arg12: memref<8x128xbf16, #tpu.memory_space<vmem>>) attributes {dimension_semantics = [#tpu.dimension_semantics<parallel>], iteration_bounds = array<i64: 1>, scalar_prefetch = 0 : i64, scratch_operands = 0 : i64, tpu.core_type = #tpu.core_type<tc>, window_params = [{transform_indices = @transform_0, window_bounds = array<i64: 8, 32>}, {pipeline_mode = #tpu.pipeline_mode<synchronous>, transform_indices = @transform_1, window_bounds = array<i64: 32, 128>}, {pipeline_mode = #tpu.pipeline_mode<synchronous>, transform_indices = @transform_2, window_bounds = array<i64: 1, 128>}, {pipeline_mode = #tpu.pipeline_mode<synchronous>, transform_indices = @transform_3, window_bounds = array<i64: 128, 256>}, {pipeline_mode = #tpu.pipeline_mode<synchronous>, transform_indices = @transform_4, window_bounds = array<i64: 1, 256>}, {pipeline_mode = #tpu.pipeline_mode<synchronous>, transform_indices = @transform_5, window_bounds = array<i64: 256, 256>}, {pipeline_mode = #tpu.pipeline_mode<synchronous>, transform_indices = @transform_6, window_bounds = array<i64: 1, 256>}, {pipeline_mode = #tpu.pipeline_mode<synchronous>, transform_indices = @transform_7, window_bounds = array<i64: 256, 128>}, {pipeline_mode = #tpu.pipeline_mode<synchronous>, transform_indices = @transform_8, window_bounds = array<i64: 1, 128>}, {pipeline_mode = #tpu.pipeline_mode<synchronous>, transform_indices = @transform_9, window_bounds = array<i64: 128, 128>}, {pipeline_mode = #tpu.pipeline_mode<synchronous>, transform_indices = @transform_10, window_bounds = array<i64: 1, 128>}, {transform_indices = @transform_11, window_bounds = array<i64: 8, 128>}]} {
    %c0 = arith.constant 0 : index
    %c0_0 = arith.constant 0 : index
    %0 = vector.load %arg1[%c0, %c0_0] : memref<8x32xf32, #tpu.memory_space<vmem>>, vector<8x32xf32>
    %1 = arith.truncf %0 : vector<8x32xf32> to vector<8x32xbf16>
    %c0_1 = arith.constant 0 : index
    %c0_2 = arith.constant 0 : index
    %2 = vector.load %arg2[%c0_1, %c0_2] : memref<32x128xbf16, #tpu.memory_space<vmem>>, vector<32x128xbf16>
    %cst = arith.constant dense<0.000000e+00> : vector<8x128xf32>
    %3 = tpu.matmul %1, %2, %cst {dimension_numbers = #tpu.dot_dimension_numbers<[1], [0], [0], [1], [0, 0, 1, 1], [], []>} : vector<8x32xbf16>, vector<32x128xbf16>, vector<8x128xf32> -> vector<8x128xf32>
    %4 = arith.truncf %3 : vector<8x128xf32> to vector<8x128xbf16>
    %c0_3 = arith.constant 0 : index
    %c0_4 = arith.constant 0 : index
    %5 = vector.load %arg3[%c0_3, %c0_4] : memref<1x128xf32, #tpu.memory_space<vmem>>, vector<1x128xf32>
    %6 = arith.truncf %5 : vector<1x128xf32> to vector<1x128xbf16>
    %7 = vector.broadcast %6 : vector<1x128xbf16> to vector<8x128xbf16>
    %8 = arith.addf %4, %7 : vector<8x128xbf16>
    %cst_5 = arith.constant 0.000000e+00 : bf16
    %9 = vector.broadcast %cst_5 : bf16 to vector<8x128xbf16>
    %10 = arith.maximumf %8, %9 : vector<8x128xbf16>
    %c0_6 = arith.constant 0 : index
    %c0_7 = arith.constant 0 : index
    %11 = vector.load %arg4[%c0_6, %c0_7] : memref<128x256xbf16, #tpu.memory_space<vmem>>, vector<128x256xbf16>
    %cst_8 = arith.constant dense<0.000000e+00> : vector<8x256xf32>
    %12 = tpu.matmul %10, %11, %cst_8 {dimension_numbers = #tpu.dot_dimension_numbers<[1], [0], [0], [1], [0, 0, 1, 1], [], []>} : vector<8x128xbf16>, vector<128x256xbf16>, vector<8x256xf32> -> vector<8x256xf32>
    %13 = arith.truncf %12 : vector<8x256xf32> to vector<8x256xbf16>
    %c0_9 = arith.constant 0 : index
    %c0_10 = arith.constant 0 : index
    %14 = vector.load %arg5[%c0_9, %c0_10] : memref<1x256xf32, #tpu.memory_space<vmem>>, vector<1x256xf32>
    %15 = arith.truncf %14 : vector<1x256xf32> to vector<1x256xbf16>
    %16 = vector.broadcast %15 : vector<1x256xbf16> to vector<8x256xbf16>
    %17 = arith.addf %13, %16 : vector<8x256xbf16>
    %cst_11 = arith.constant 0.000000e+00 : bf16
    %18 = vector.broadcast %cst_11 : bf16 to vector<8x256xbf16>
    %19 = arith.maximumf %17, %18 : vector<8x256xbf16>
    %c0_12 = arith.constant 0 : index
    %c0_13 = arith.constant 0 : index
    %20 = vector.load %arg6[%c0_12, %c0_13] : memref<256x256xbf16, #tpu.memory_space<vmem>>, vector<256x256xbf16>
    %cst_14 = arith.constant dense<0.000000e+00> : vector<8x256xf32>
    %21 = tpu.matmul %19, %20, %cst_14 {dimension_numbers = #tpu.dot_dimension_numbers<[1], [0], [0], [1], [0, 0, 1, 1], [], []>} : vector<8x256xbf16>, vector<256x256xbf16>, vector<8x256xf32> -> vector<8x256xf32>
    %22 = arith.truncf %21 : vector<8x256xf32> to vector<8x256xbf16>
    %c0_15 = arith.constant 0 : index
    %c0_16 = arith.constant 0 : index
    %23 = vector.load %arg7[%c0_15, %c0_16] : memref<1x256xf32, #tpu.memory_space<vmem>>, vector<1x256xf32>
    %24 = arith.truncf %23 : vector<1x256xf32> to vector<1x256xbf16>
    %25 = vector.broadcast %24 : vector<1x256xbf16> to vector<8x256xbf16>
    %26 = arith.addf %22, %25 : vector<8x256xbf16>
    %cst_17 = arith.constant 0.000000e+00 : bf16
    %27 = vector.broadcast %cst_17 : bf16 to vector<8x256xbf16>
    %28 = arith.maximumf %26, %27 : vector<8x256xbf16>
    %c0_18 = arith.constant 0 : index
    %c0_19 = arith.constant 0 : index
    %29 = vector.load %arg8[%c0_18, %c0_19] : memref<256x128xbf16, #tpu.memory_space<vmem>>, vector<256x128xbf16>
    %cst_20 = arith.constant dense<0.000000e+00> : vector<8x128xf32>
    %30 = tpu.matmul %28, %29, %cst_20 {dimension_numbers = #tpu.dot_dimension_numbers<[1], [0], [0], [1], [0, 0, 1, 1], [], []>} : vector<8x256xbf16>, vector<256x128xbf16>, vector<8x128xf32> -> vector<8x128xf32>
    %31 = arith.truncf %30 : vector<8x128xf32> to vector<8x128xbf16>
    %c0_21 = arith.constant 0 : index
    %c0_22 = arith.constant 0 : index
    %32 = vector.load %arg9[%c0_21, %c0_22] : memref<1x128xf32, #tpu.memory_space<vmem>>, vector<1x128xf32>
    %33 = arith.truncf %32 : vector<1x128xf32> to vector<1x128xbf16>
    %34 = vector.broadcast %33 : vector<1x128xbf16> to vector<8x128xbf16>
    %35 = arith.addf %31, %34 : vector<8x128xbf16>
    %cst_23 = arith.constant 0.000000e+00 : bf16
    %36 = vector.broadcast %cst_23 : bf16 to vector<8x128xbf16>
    %37 = arith.maximumf %35, %36 : vector<8x128xbf16>
    %c0_24 = arith.constant 0 : index
    %c0_25 = arith.constant 0 : index
    %38 = vector.load %arg10[%c0_24, %c0_25] : memref<128x128xbf16, #tpu.memory_space<vmem>>, vector<128x128xbf16>
    %cst_26 = arith.constant dense<0.000000e+00> : vector<8x128xf32>
    %39 = tpu.matmul %37, %38, %cst_26 {dimension_numbers = #tpu.dot_dimension_numbers<[1], [0], [0], [1], [0, 0, 1, 1], [], []>} : vector<8x128xbf16>, vector<128x128xbf16>, vector<8x128xf32> -> vector<8x128xf32>
    %c0_27 = arith.constant 0 : index
    %c0_28 = arith.constant 0 : index
    %40 = vector.load %arg11[%c0_27, %c0_28] : memref<1x128xf32, #tpu.memory_space<vmem>>, vector<1x128xf32>
    %41 = vector.broadcast %40 : vector<1x128xf32> to vector<8x128xf32>
    %42 = arith.addf %39, %41 : vector<8x128xf32>
    %43 = arith.truncf %42 : vector<8x128xf32> to vector<8x128xbf16>
    %c0_29 = arith.constant 0 : index
    %c0_30 = arith.constant 0 : index
    %44 = vector.load %arg12[%c0_29, %c0_30] : memref<8x128xbf16, #tpu.memory_space<vmem>>, vector<8x128xbf16>
    tpu.vector_store %arg12[%c0_29, %c0_30], %43 {strides = array<i32>} : memref<8x128xbf16, #tpu.memory_space<vmem>>, vector<8x128xbf16>,
    return
  }
  func.func @transform_0(%arg0: i32) -> (i32, i32) {
    %c0_i32 = arith.constant 0 : i32
    %c0_i32_0 = arith.constant 0 : i32
    return %arg0, %c0_i32 : i32, i32
  }
  func.func @transform_1(%arg0: i32) -> (i32, i32) {
    %c0_i32 = arith.constant 0 : i32
    %c0_i32_0 = arith.constant 0 : i32
    %c0_i32_1 = arith.constant 0 : i32
    return %c0_i32, %c0_i32_0 : i32, i32
  }
  func.func @transform_2(%arg0: i32) -> (i32, i32) {
    %c0_i32 = arith.constant 0 : i32
    %c0_i32_0 = arith.constant 0 : i32
    %c0_i32_1 = arith.constant 0 : i32
    return %c0_i32, %c0_i32_0 : i32, i32
  }
  func.func @transform_3(%arg0: i32) -> (i32, i32) {
    %c0_i32 = arith.constant 0 : i32
    %c0_i32_0 = arith.constant 0 : i32
    %c0_i32_1 = arith.constant 0 : i32
    return %c0_i32, %c0_i32_0 : i32, i32
  }
  func.func @transform_4(%arg0: i32) -> (i32, i32) {
    %c0_i32 = arith.constant 0 : i32
    %c0_i32_0 = arith.constant 0 : i32
    %c0_i32_1 = arith.constant 0 : i32
    return %c0_i32, %c0_i32_0 : i32, i32
  }
  func.func @transform_5(%arg0: i32) -> (i32, i32) {
    %c0_i32 = arith.constant 0 : i32
    %c0_i32_0 = arith.constant 0 : i32
    %c0_i32_1 = arith.constant 0 : i32
    return %c0_i32, %c0_i32_0 : i32, i32
  }
  func.func @transform_6(%arg0: i32) -> (i32, i32) {
    %c0_i32 = arith.constant 0 : i32
    %c0_i32_0 = arith.constant 0 : i32
    %c0_i32_1 = arith.constant 0 : i32
    return %c0_i32, %c0_i32_0 : i32, i32
  }
  func.func @transform_7(%arg0: i32) -> (i32, i32) {
    %c0_i32 = arith.constant 0 : i32
    %c0_i32_0 = arith.constant 0 : i32
    %c0_i32_1 = arith.constant 0 : i32
    return %c0_i32, %c0_i32_0 : i32, i32
  }
  func.func @transform_8(%arg0: i32) -> (i32, i32) {
    %c0_i32 = arith.constant 0 : i32
    %c0_i32_0 = arith.constant 0 : i32
    %c0_i32_1 = arith.constant 0 : i32
    return %c0_i32, %c0_i32_0 : i32, i32
  }
  func.func @transform_9(%arg0: i32) -> (i32, i32) {
    %c0_i32 = arith.constant 0 : i32
    %c0_i32_0 = arith.constant 0 : i32
    %c0_i32_1 = arith.constant 0 : i32
    return %c0_i32, %c0_i32_0 : i32, i32
  }
  func.func @transform_10(%arg0: i32) -> (i32, i32) {
    %c0_i32 = arith.constant 0 : i32
    %c0_i32_0 = arith.constant 0 : i32
    %c0_i32_1 = arith.constant 0 : i32
    return %c0_i32, %c0_i32_0 : i32, i32
  }
  func.func @transform_11(%arg0: i32) -> (i32, i32) {
    %c0_i32 = arith.constant 0 : i32
    %c0_i32_0 = arith.constant 0 : i32
    return %arg0, %c0_i32 : i32, i32
  }
}

</mosaic_0001>

<bundles_post_ra>
// kernel: ann_forward.1
= control target key start
LH: loop header
LB: loop body
LE: loop exit
PB: predicated region body
PF: predicated region fallthrough
CT: control target
= control target key end

     0   :  { %16 = vsyncpa [#allocation3], 0  ;;  %s1431_s0 = inlined_call_operand.vmem [shape: f32[8,32], index: 0, kind: input, shape index: {}]   ;;  %s1432_s1 = inlined_call_operand.hbm [shape: bf16[32,128], index: 1, kind: input, shape index: {}]   ;;  %s1433_s2 = inlined_call_operand.vmem [shape: f32[1,128], index: 2, kind: input, shape index: {}]   ;;  %s1434_s3 = inlined_call_operand.hbm [shape: bf16[128,256], index: 3, kind: input, shape index: {}]   ;;  %s1435_s4 = inlined_call_operand.vmem [shape: f32[1,256], index: 4, kind: input, shape index: {}]   ;;  %s1436_s5 = inlined_call_operand.hbm [shape: bf16[256,256], index: 5, kind: input, shape index: {}]   ;;  %s1437_s6 = inlined_call_operand.vmem [shape: f32[1,256], index: 6, kind: input, shape index: {}]   ;;  %s1438_s7 = inlined_call_operand.hbm [shape: bf16[256,128], index: 7, kind: input, shape index: {}]   ;;  %s1439_s8 = inlined_call_operand.vmem [shape: f32[1,128], index: 8, kind: input, shape index: {}]   ;;  %s1440_s9 = inlined_call_operand.hbm [shape: bf16[128,128], index: 9, kind: input, shape index: {}]   ;;  %s1441_s10 = inlined_call_operand.vmem [shape: f32[1,128], index: 10, kind: input, shape index: {}]   ;;  %s1442_s11 = inlined_call_operand.vmem [shape: bf16[8,128], index: 11, kind: output, shape index: {}]  }
   0x1   :  { %17 = vsyncpa [#allocation5], 0 }
   0x2   :  { %18 = vsyncpa [#allocation8], 0  ;;  %s1273_s17 = smov [#allocation4]  }
   0x3   :  { %s40_s18 = sshll.u32 %s1273_s17, 4  ;;  %s41_s18 = int_to_ptr.vmem [resolvable:$true] %s40_s18 }
   0x4   :  { %s1175_s19 = scalar_lea.vmem %s41_s18, 2048  ;;  %p1180_p1 = scmp.lt.s32.totalorder %s41_s18, %s41_s18 }
   0x5   :  { %p1176_p0 = scmp.ne.s32.totalorder %s41_s18, %s1175_s19  ;;  %p1181_p2 = scmp.lt.s32.totalorder %s1175_s19, %s1175_s19 }
   0x7   :  { %p1182_p3 = por %p1181_p2, %p1180_p1 }
   0x9   :  { %p1183_p4 = pnand %p1182_p3, %p1176_p0 }
   0xb   :  { %1186 = shalt.err (!%p1183_p4)
}
   0xc   :  { %s1274_s20 = smov 128   ;;  %s1275_s21 = smov 8  }
   0xd   :  { %46 = dma.hbm_to_vmem [thread:$0]  %s1434_s3, 2048, %s41_s18, [#allocation5], %s1274_s20, %s1274_s20, %s1275_s21  }
   0xe   :  { %s1276_s24 = smov [#allocation7]   ;;  %s1277_s26 = smov [#allocation2]  }
   0xf   :  { %s68_s25 = sshll.u32 %s1276_s24, 4  ;;  %s26_s27 = sshll.u32 %s1277_s26, 4  ;;  %s69_s25 = int_to_ptr.vmem [resolvable:$true] %s68_s25  ;;  %s27_s27 = int_to_ptr.vmem [resolvable:$true] %s26_s27 }
  0x10   :  { %s1195_s28 = scalar_lea.vmem %s69_s25, 2048  ;;  %p1200_p6 = scmp.lt.s32.totalorder %s69_s25, %s69_s25 }
  0x11   :  { %p1196_p5 = scmp.ne.s32.totalorder %s69_s25, %s1195_s28  ;;  %p1201_p7 = scmp.lt.s32.totalorder %s1195_s28, %s1195_s28 }
  0x13   :  { %p1202_p8 = por %p1201_p7, %p1200_p6 }
  0x15   :  { %p1203_p9 = pnand %p1202_p8, %p1196_p5 }
  0x17   :  { %1206 = shalt.err (!%p1203_p9)
}
  0x18   :  { %s1278_s29 = smov 64   ;;  %s1279_s30 = smov 4  }
  0x19   :  { %74 = dma.hbm_to_vmem [thread:$0]  %s1438_s7, 2048, %s69_s25, [#allocation8], %s1278_s29, %s1278_s29, %s1279_s30  }
  0x1a   :  { %s1215_s3 = scalar_lea.vmem %s27_s27, 256  ;;  %p1220_p11 = scmp.lt.s32.totalorder %s27_s27, %s27_s27 }
  0x1b   :  { %p1216_p10 = scmp.ne.s32.totalorder %s27_s27, %s1215_s3  ;;  %p1221_p12 = scmp.lt.s32.totalorder %s1215_s3, %s1215_s3 }
  0x1d   :  { %p1222_p13 = por %p1221_p12, %p1220_p11 }
  0x1f   :  { %p1223_p0 = pnand %p1222_p13, %p1216_p10 }
  0x21   :  { %1226 = shalt.err (!%p1223_p0)
}
  0x22   :  { %32 = dma.hbm_to_vmem [thread:$0]  %s1432_s1, 256, %s27_s27, [#allocation3], %s1278_s29, %s1278_s29, %s1279_s30  }
  0x23   :  { %s1280_s16 = smov [#allocation6]   ;;  %s1281_s18 = smov [#allocation9]  }
  0x24   :  { %s54_s17 = sshll.u32 %s1280_s16, 4  ;;  %s82_s7 = sshll.u32 %s1281_s18, 4  ;;  %s55_s17 = int_to_ptr.vmem [resolvable:$true] %s54_s17  ;;  %s83_s7 = int_to_ptr.vmem [resolvable:$true] %s82_s7 }
  0x25   :  { %s1235_s19 = scalar_lea.vmem %s55_s17, 4096  ;;  %p1240_p2 = scmp.lt.s32.totalorder %s55_s17, %s55_s17 }
  0x26   :  { %p1236_p1 = scmp.ne.s32.totalorder %s55_s17, %s1235_s19  ;;  %p1241_p3 = scmp.lt.s32.totalorder %s1235_s19, %s1235_s19 }
  0x28   :  { %p1242_p4 = por %p1241_p3, %p1240_p2 }
  0x2a   :  { %p1243_p5 = pnand %p1242_p4, %p1236_p1 }
  0x2c   :  { %1246 = shalt.err (!%p1243_p5)
}
  0x2d   :  { %60 = dma.hbm_to_vmem [thread:$0]  %s1436_s5, 4096, %s55_s17, [#allocation5], %s1274_s20, %s1274_s20, %s1275_s21  }
  0x2e   :  { %s1255_s1 = scalar_lea.vmem %s83_s7, 1024  ;;  %p1260_p7 = scmp.lt.s32.totalorder %s83_s7, %s83_s7 }
  0x2f   :  { %p1256_p6 = scmp.ne.s32.totalorder %s83_s7, %s1255_s1  ;;  %p1261_p8 = scmp.lt.s32.totalorder %s1255_s1, %s1255_s1 }
  0x31   :  { %p1262_p9 = por %p1261_p8, %p1260_p7 }
  0x33   :  { %p1263_p10 = pnand %p1262_p9, %p1256_p6 }
  0x35   :  { %1266 = shalt.err (!%p1263_p10)
}
  0x36   :  { %88 = dma.hbm_to_vmem [thread:$0]  %s1440_s9, 1024, %s83_s7, [#allocation8], %s1278_s29, %s1278_s29, %s1279_s30  }
  0x37   :  { %1267 = dma.done.wait [#allocation3], 256  }
  0x38   :  { %1268 = vsyncadd [#allocation3], 4294967040 }
  0x39   :  { %1269 = dma.done.wait [#allocation5], 6144  }
  0x3a   :  { %1270 = vsyncadd [#allocation5], 4294961152 }
  0x3b   :  { %1271 = dma.done.wait [#allocation8], 3072  }
  0x3c   :  { %1272 = vsyncadd [#allocation8], 4294964224  ;;  %v1282_v0 = vmov 0.0   ;;  %vm1283_vm0 = vmmov 0   ;;  %v1069_v1 = vld [vmem:[#allocation2 + $0x8] sm:$0xff]   ;;  %v1070_v2 = vld [vmem:[#allocation2] sm:$0xff]   ;;  %v175_v50 = vlaneseq }
  0x3d   :  { %1029 = vmatprep.subr.bf16.mxu0 %v1282_v0  ;;  %1033 = vmatprep.mubr.msk.bf16.mxu0 %vm1283_vm0, %v1282_v0  ;;  %v107_v3 = vld [vmem:[%s1431_s0] sm:$0xff]  ;;  %v1074_v6 = vld [vmem:[#allocation4 + $0x64] ss:$8 sps:$4 sm:$0xff]   ;;  %vm125_vm1 = vcmask 261120   ;;  %v1076_v8 = vld [vmem:[#allocation4 + $0x60] ss:$8 sps:$4 sm:$0xff]  }
  0x3e   :  { %1030 = vmatpush3.bf16.msra.mxu0 %v1069_v1  ;;  %v1071_v4 = vld [vmem:[#allocation4 + $0x74] ss:$8 sps:$4 sm:$0xff]   ;;  %v1073_v5 = vld [vmem:[#allocation4 + $0x70] ss:$8 sps:$4 sm:$0xff]   ;;  %v108_v7 = vpack.c.bf16 %v107_v3, %v107_v3  ;;  %v1080_v11 = vld [vmem:[#allocation4 + $0x44] ss:$8 sps:$4 sm:$0xff]  }
  0x3f   :  { %1031 = vmatprep.subr.bf16.mxu0 %v1282_v0  ;;  %277 = vmatprep.subr.bf16.mxu1 %v1071_v4  ;;  %v1077_v9 = vld [vmem:[#allocation4 + $0x54] ss:$8 sps:$4 sm:$0xff]   ;;  %v1079_v10 = vld [vmem:[#allocation4 + $0x50] ss:$8 sps:$4 sm:$0xff]   ;;  %v1082_v12 = vld [vmem:[#allocation4 + $0x40] ss:$8 sps:$4 sm:$0xff]  }
  0x40   :  { %278 = vmatpush1.bf16.msra.mxu1 %v1073_v5  ;;  %v1083_v13 = vld [vmem:[#allocation4 + $0x34] ss:$8 sps:$4 sm:$0xff]   ;;  %v1085_v14 = vld [vmem:[#allocation4 + $0x30] ss:$8 sps:$4 sm:$0xff]   ;;  %v1086_v15 = vld [vmem:[#allocation4 + $0x24] ss:$8 sps:$4 sm:$0xff]  }
  0x41   :  { %279 = vmatprep.subr.bf16.mxu1 %v1074_v6  ;;  %v1088_v16 = vld [vmem:[#allocation4 + $0x20] ss:$8 sps:$4 sm:$0xff]   ;;  %v1089_v17 = vld [vmem:[#allocation4 + $0x14] ss:$8 sps:$4 sm:$0xff]   ;;  %v1091_v18 = vld [vmem:[#allocation4 + $0x10] ss:$8 sps:$4 sm:$0xff]  }
  0x42   :  { %1032 = vmatpush3.bf16.msra.mxu0 %v1070_v2  ;;  %v1092_v19 = vld [vmem:[#allocation4 + $0x4] ss:$8 sps:$4 sm:$0xff]   ;;  %v1094_v20 = vld [vmem:[#allocation4] ss:$8 sps:$4 sm:$0xff]   ;;  %v1284_v21 = vmov 0   ;;  %v1386_v53 = vshrl.u32 %v175_v50, 7 }
  0x43   :  { %309 = vmatprep.mubr.bf16.mxu1 %v1284_v21  ;;  %v1095_v22 = vld [vmem:[#allocation6 + $0x70] ss:$8 sps:$4 sm:$0xff]   ;;  %v1097_v23 = vld [vmem:[#allocation6 + $0x74] ss:$8 sps:$4 sm:$0xff]   ;;  %v1100_v24 = vld [vmem:[#allocation6 + $0x64] ss:$8 sps:$4 sm:$0xff]  }
  0x44   :  { %280 = vmatpush1.bf16.msra.mxu1 %v1076_v8  ;;  %544 = vmatprep.subr.bf16.mxu0 %v1097_v23  ;;  %v1098_v25 = vld [vmem:[#allocation6 + $0x60] ss:$8 sps:$4 sm:$0xff]   ;;  %v1103_v26 = vld [vmem:[#allocation6 + $0x54] ss:$8 sps:$4 sm:$0xff]   ;;  %v1101_v27 = vld [vmem:[#allocation6 + $0x50] ss:$8 sps:$4 sm:$0xff]  }
  0x45   :  { %1034 = vmatmul.mubr.msk.bf16.vlgmr.msra.gmra.mxu0 %vm125_vm1, %v108_v7  ;;  %281 = vmatprep.subr.bf16.mxu1 %v1077_v9  ;;  %v1106_v28 = vld [vmem:[#allocation6 + $0x44] ss:$8 sps:$4 sm:$0xff]   ;;  %v1104_v29 = vld [vmem:[#allocation6 + $0x40] ss:$8 sps:$4 sm:$0xff]   ;;  %v1109_v30 = vld [vmem:[#allocation6 + $0x34] ss:$8 sps:$4 sm:$0xff]  }
  0x46   :  { %545 = vmatpush1.bf16.msra.mxu0 %v1095_v22  ;;  %v1107_v31 = vld [vmem:[#allocation6 + $0x30] ss:$8 sps:$4 sm:$0xff]   ;;  %v1112_v32 = vld [vmem:[#allocation6 + $0x24] ss:$8 sps:$4 sm:$0xff]   ;;  %v1110_v33 = vld [vmem:[#allocation6 + $0x20] ss:$8 sps:$4 sm:$0xff]  }
  0x47   :  { %546 = vmatprep.subr.bf16.mxu0 %v1100_v24  ;;  %v1115_v34 = vld [vmem:[#allocation6 + $0x14] ss:$8 sps:$4 sm:$0xff]   ;;  %v1113_v35 = vld [vmem:[#allocation6 + $0x10] ss:$8 sps:$4 sm:$0xff]   ;;  %v1118_v36 = vld [vmem:[#allocation6 + $0x4] ss:$8 sps:$4 sm:$0xff]  }
  0x48   :  { %282 = vmatpush1.bf16.msra.mxu1 %v1079_v10  ;;  %v1116_v37 = vld [vmem:[#allocation6] ss:$8 sps:$4 sm:$0xff]   ;;  %v1121_v38 = vld [vmem:[#allocation6 + $0xf4] ss:$8 sps:$4 sm:$0xff]   ;;  %v1119_v39 = vld [vmem:[#allocation6 + $0xf0] ss:$8 sps:$4 sm:$0xff]  }
  0x49   :  { %283 = vmatprep.subr.bf16.mxu1 %v1080_v11  ;;  %v1124_v40 = vld [vmem:[#allocation6 + $0xe4] ss:$8 sps:$4 sm:$0xff]   ;;  %v1122_v41 = vld [vmem:[#allocation6 + $0xe0] ss:$8 sps:$4 sm:$0xff]   ;;  %v1127_v42 = vld [vmem:[#allocation6 + $0xd4] ss:$8 sps:$4 sm:$0xff]  }
  0x4a   :  { %547 = vmatpush1.bf16.msra.mxu0 %v1098_v25  ;;  %v1125_v43 = vld [vmem:[#allocation6 + $0xd0] ss:$8 sps:$4 sm:$0xff]   ;;  %v1130_v44 = vld [vmem:[#allocation6 + $0xc4] ss:$8 sps:$4 sm:$0xff]   ;;  %v1128_v45 = vld [vmem:[#allocation6 + $0xc0] ss:$8 sps:$4 sm:$0xff]  }
  0x4b   :  { %548 = vmatprep.subr.bf16.mxu0 %v1103_v26  ;;  %v1133_v46 = vld [vmem:[#allocation6 + $0xb4] ss:$8 sps:$4 sm:$0xff]   ;;  %v1131_v47 = vld [vmem:[#allocation6 + $0xb0] ss:$8 sps:$4 sm:$0xff]   ;;  %v1136_v48 = vld [vmem:[#allocation6 + $0xa4] ss:$8 sps:$4 sm:$0xff]  }
  0x4c   :  { %284 = vmatpush1.bf16.msra.mxu1 %v1082_v12  ;;  %v1134_v49 = vld [vmem:[#allocation6 + $0xa0] ss:$8 sps:$4 sm:$0xff]   ;;  %v170_v51 = vld [vmem:[%s1433_s2] sm:$0x1]  ;;  %v1389_v55 = vsub.s32 0, %v1386_v53  ;;  %v1143_v5 = vld [vmem:[#allocation7 + $0x78] sm:$0xff]  }
  0x4d   :  { %285 = vmatprep.subr.bf16.mxu1 %v1083_v13  ;;  %v171_v52 = vpack.c.bf16 %v170_v51, %v170_v51  ;;  %v1139_v1 = vld [vmem:[#allocation6 + $0x94] ss:$8 sps:$4 sm:$0xff]   ;;  %v1137_v2 = vld [vmem:[#allocation6 + $0x90] ss:$8 sps:$4 sm:$0xff]   ;;  %v1142_v3 = vld [vmem:[#allocation6 + $0x84] ss:$8 sps:$4 sm:$0xff]  }
  0x4e   :  { %549 = vmatpush1.bf16.msra.mxu0 %v1101_v27  ;;  %v1140_v4 = vld [vmem:[#allocation6 + $0x80] ss:$8 sps:$4 sm:$0xff]   ;;  %v1144_v6 = vld [vmem:[#allocation7 + $0x38] sm:$0xff]   ;;  %v1145_v7 = vld [vmem:[#allocation7 + $0x70] sm:$0xff]  }
  0x4f   :  { %550 = vmatprep.subr.bf16.mxu0 %v1106_v28  ;;  %v173_v54 = vpack.i.b16 %v171_v52, %v171_v52  ;;  %v1146_v8 = vld [vmem:[#allocation7 + $0x30] sm:$0xff]   ;;  %v1147_v9 = vld [vmem:[#allocation7 + $0x68] sm:$0xff]   ;;  %v1149_v11 = vld [vmem:[#allocation7 + $0x60] sm:$0xff]  }
  0x50   :  { %286 = vmatpush1.bf16.msra.mxu1 %v1085_v14  ;;  %v1148_v10 = vld [vmem:[#allocation7 + $0x28] sm:$0xff]   ;;  %v1150_v12 = vld [vmem:[#allocation7 + $0x20] sm:$0xff]   ;;  %v1151_v13 = vld [vmem:[#allocation7 + $0x58] sm:$0xff]  }
  0x51   :  { %287 = vmatprep.subr.bf16.mxu1 %v1086_v15  ;;  %v178_v56 = vrot.slane %v173_v54, %v1389_v55  ;;  %v1152_v14 = vld [vmem:[#allocation7 + $0x18] sm:$0xff]   ;;  %v1153_v15 = vld [vmem:[#allocation7 + $0x50] sm:$0xff]  }
  0x52   :  { %551 = vmatpush1.bf16.msra.mxu0 %v1104_v29 }
  0x53   :  { %552 = vmatprep.subr.bf16.mxu0 %v1109_v30 }
  0x54   :  { %288 = vmatpush1.bf16.msra.mxu1 %v1088_v16  ;;  %v1154_v16 = vld [vmem:[#allocation7 + $0x10] sm:$0xff]  }
  0x55   :  { %289 = vmatprep.subr.bf16.mxu1 %v1089_v17  ;;  %v320_v17 = vld [vmem:[%s1435_s4] sm:$0x3] }
  0x56   :  { %553 = vmatpush1.bf16.msra.mxu0 %v1107_v31 }
  0x57   :  { %554 = vmatprep.subr.bf16.mxu0 %v1112_v32 }
  0x58   :  { %290 = vmatpush1.bf16.msra.mxu1 %v1091_v18  ;;  %v328_v18 = vsub.s32 1, %v1386_v53 }
  0x59   :  { %291 = vmatprep.subr.bf16.mxu1 %v1092_v19  ;;  %v325_v19 = vrot.slane %v320_v17, %v1389_v55 }
  0x5a   :  { %555 = vmatpush1.bf16.msra.mxu0 %v1110_v33 }
  0x5b   :  { %556 = vmatprep.subr.bf16.mxu0 %v1115_v34  ;;  %v332_v22 = vpack.c.bf16 %v325_v19, %v325_v19 }
  0x5c   :  { %292 = vmatpush1.bf16.msra.mxu1 %v1094_v20  ;;  %v329_v20 = vrot.slane %v320_v17, %v328_v18 }
  0x5d   :  { %998 = vmatprep.subr.bf16.mxu1 %v1143_v5  ;;  %v335_v24 = vpack.i.b16 %v332_v22, %v332_v22  ;;  %v1165_v5 = vld [vmem:[#allocation9 + $0x8] sm:$0xff]  }
  0x5e   :  { %557 = vmatpush1.bf16.msra.mxu0 %v1113_v35  ;;  %v333_v23 = vpack.c.bf16 %v329_v20, %v329_v20 }
  0x5f   :  { %558 = vmatprep.subr.bf16.mxu0 %v1118_v36  ;;  %v340_v27 = vrot.slane %v335_v24, %v1389_v55 }
  0x60   :  { %v342_v25 = vpack.i.b16 %v333_v23, %v333_v23 }
  0x62   :  { %559 = vmatpush1.bf16.msra.mxu0 %v1116_v37  ;;  %v347_v29 = vrot.slane %v342_v25, %v1389_v55 }
  0x63   :  { %560 = vmatprep.subr.bf16.mxu0 %v1121_v38  ;;  %v1155_v38 = vld [vmem:[#allocation7 + $0x48] sm:$0xff]  }
  0x66   :  { %561 = vmatpush2.bf16.msra.mxu0 %v1119_v39  ;;  %v1156_v39 = vld [vmem:[#allocation7 + $0x8] sm:$0xff]  }
  0x67   :  { %562 = vmatprep.subr.bf16.mxu0 %v1124_v40  ;;  %v1157_v40 = vld [vmem:[#allocation7 + $0x40] sm:$0xff]  }
  0x6a   :  { %563 = vmatpush2.bf16.msra.mxu0 %v1122_v41  ;;  %v1158_v41 = vld [vmem:[#allocation7] sm:$0xff]  }
  0x6b   :  { %564 = vmatprep.subr.bf16.mxu0 %v1127_v42  ;;  %v587_v42 = vld [vmem:[%s1437_s6] sm:$0x3] }
  0x6e   :  { %565 = vmatpush2.bf16.msra.mxu0 %v1125_v43  ;;  %v592_v43 = vrot.slane %v587_v42, %v1389_v55 }
  0x6f   :  { %566 = vmatprep.subr.bf16.mxu0 %v1130_v44  ;;  %v596_v44 = vrot.slane %v587_v42, %v328_v18 }
  0x72   :  { %567 = vmatpush2.bf16.msra.mxu0 %v1128_v45  ;;  %v599_v45 = vpack.c.bf16 %v592_v43, %v592_v43 }
  0x73   :  { %568 = vmatprep.subr.bf16.mxu0 %v1133_v46  ;;  %v600_v46 = vpack.c.bf16 %v596_v44, %v596_v44 }
  0x76   :  { %569 = vmatpush2.bf16.msra.mxu0 %v1131_v47  ;;  %v602_v47 = vpack.i.b16 %v599_v45, %v599_v45 }
  0x77   :  { %570 = vmatprep.subr.bf16.mxu0 %v1136_v48  ;;  %v609_v48 = vpack.i.b16 %v600_v46, %v600_v46 }
  0x78   :  { %v607_v50 = vrot.slane %v602_v47, %v1389_v55 }
  0x79   :  { %v614_v52 = vrot.slane %v609_v48, %v1389_v55 }
  0x7a   :  { %571 = vmatpush2.bf16.msra.mxu0 %v1134_v49 }
  0x7b   :  { %572 = vmatprep.subr.bf16.mxu0 %v1139_v1  ;;  %v1161_v1 = vld [vmem:[#allocation9 + $0x28] sm:$0xff]  }
  0x7e   :  { %573 = vmatpush2.bf16.msra.mxu0 %v1137_v2  ;;  %v1162_v2 = vld [vmem:[#allocation9 + $0x20] sm:$0xff]  }
  0x7f   :  { %574 = vmatprep.subr.bf16.mxu0 %v1142_v3  ;;  %v1163_v3 = vld [vmem:[#allocation9 + $0x18] sm:$0xff]  }
  0x82   :  { %575 = vmatpush2.bf16.msra.mxu0 %v1140_v4  ;;  %v1164_v4 = vld [vmem:[#allocation9 + $0x10] sm:$0xff]  }
 0x105   :  { %v163_v57 = vpop.f32.mrf.mxu0 }
 0x106   :  { %v169_v58 = vpack.c.bf16 %v163_v57, %v163_v57 }
 0x107   :  { %v1035_v59 = vpop.f32.mrf.mxu0 }
 0x108   :  { %v179_v60 = vadd.bf16 %v178_v56, %v169_v58 }
 0x109   :  { %v166_v61 = vpop.f32.mrf.mxu0 }
 0x10a   :  { %v180_v62 = vmax.bf16 %v1284_v21, %v179_v60  ;;  %v1159_v61 = vld [vmem:[#allocation9 + $0x38] sm:$0xff]  }
 0x10b   :  { %v1036_v63 = vpop.f32.mrf.mxu0 }
 0x10c   :  { %310 = vmatmul.mubr.bf16.vlgmr.msra.gmra.mxu1 %v180_v62  ;;  %v1160_v63 = vld [vmem:[#allocation9 + $0x30] sm:$0xff]  }
 0x10d   :  { %999 = vmatpush3.bf16.msra.mxu1 %v1144_v6  ;;  %v1166_v6 = vld [vmem:[#allocation9] sm:$0xff]  }
 0x10e   :  { %1000 = vmatprep.subr.bf16.mxu1 %v1145_v7  ;;  %v788_v7 = vld [vmem:[%s1439_s8] sm:$0x1] }
 0x111   :  { %1001 = vmatpush3.bf16.msra.mxu1 %v1146_v8  ;;  %v789_v8 = vpack.c.bf16 %v788_v7, %v788_v7 }
 0x112   :  { %1002 = vmatprep.subr.bf16.mxu1 %v1147_v9 }
 0x113   :  { %v791_v9 = vpack.i.b16 %v789_v8, %v789_v8 }
 0x115   :  { %1003 = vmatpush3.bf16.msra.mxu1 %v1148_v10 }
 0x116   :  { %1004 = vmatprep.subr.bf16.mxu1 %v1149_v11 }
 0x119   :  { %1005 = vmatpush3.bf16.msra.mxu1 %v1150_v12 }
 0x11a   :  { %1006 = vmatprep.subr.bf16.mxu1 %v1151_v13  ;;  %v796_v13 = vrot.slane %v791_v9, %v1389_v55 }
 0x11d   :  { %1007 = vmatpush3.bf16.msra.mxu1 %v1152_v14 }
 0x11e   :  { %1008 = vmatprep.subr.bf16.mxu1 %v1153_v15 }
 0x121   :  { %1009 = vmatpush3.bf16.msra.mxu1 %v1154_v16 }
 0x122   :  { %1010 = vmatprep.subr.bf16.mxu1 %v1155_v38 }
 0x125   :  { %1011 = vmatpush3.bf16.msra.mxu1 %v1156_v39 }
 0x126   :  { %1012 = vmatprep.subr.bf16.mxu1 %v1157_v40 }
 0x129   :  { %1013 = vmatpush3.bf16.msra.mxu1 %v1158_v41 }
 0x12a   :  { %1037 = vmatprep.subr.bf16.mxu1 %v1282_v0 }
 0x1cc   :  { %v311_v26 = vpop.f32.mrf.mxu1 }
 0x1cd   :  { %v318_v28 = vpack.c.bf16 %v311_v26, %v311_v26 }
 0x1ce   :  { %v313_v30 = vpop.f32.mrf.mxu1 }
 0x1cf   :  { %v319_v31 = vpack.c.bf16 %v313_v30, %v313_v30  ;;  %v348_v32 = vadd.bf16 %v340_v27, %v318_v28 }
 0x1d0   :  { %v315_v33 = vpop.f32.mrf.mxu1 }
 0x1d1   :  { %v349_v34 = vadd.bf16 %v347_v29, %v319_v31  ;;  %v350_v37 = vmax.bf16 %v1284_v21, %v348_v32 }
 0x1d2   :  { %v316_v35 = vpop.f32.mrf.mxu1 }
 0x1d3   :  { %v351_v36 = vmax.bf16 %v1284_v21, %v349_v34 }
 0x1d5   :  { %576 = vmatprep.mubr.bf16.mxu0 %v351_v36 }
 0x1d6   :  { %577 = vmatmul.mubr.bf16.vlgmr.msra.gmra.mxu0 %v350_v37 }
 0x296   :  { %v578_v49 = vpop.f32.mrf.mxu0 }
 0x297   :  { %v585_v51 = vpack.c.bf16 %v578_v49, %v578_v49 }
 0x298   :  { %v580_v53 = vpop.f32.mrf.mxu0 }
 0x299   :  { %v586_v54 = vpack.c.bf16 %v580_v53, %v580_v53  ;;  %v615_v56 = vadd.bf16 %v607_v50, %v585_v51 }
 0x29a   :  { %v582_v57 = vpop.f32.mrf.mxu0 }
 0x29b   :  { %v616_v58 = vadd.bf16 %v614_v52, %v586_v54  ;;  %v617_v62 = vmax.bf16 %v1284_v21, %v615_v56 }
 0x29c   :  { %v583_v59 = vpop.f32.mrf.mxu0 }
 0x29d   :  { %v618_v60 = vmax.bf16 %v1284_v21, %v616_v58 }
 0x29f   :  { %779 = vmatprep.mubr.bf16.mxu1 %v618_v60 }
 0x2a0   :  { %780 = vmatmul.mubr.bf16.vlgmr.msra.gmra.mxu1 %v617_v62 }
 0x2a1   :  { %1038 = vmatpush3.bf16.msra.mxu1 %v1159_v61  ;;  %1053 = vmatprep.mubr.msk.bf16.mxu1 %vm1283_vm0, %v1282_v0 }
 0x2a2   :  { %1039 = vmatprep.subr.bf16.mxu1 %v1282_v0 }
 0x2a5   :  { %1040 = vmatpush3.bf16.msra.mxu1 %v1160_v63 }
 0x2a6   :  { %1041 = vmatprep.subr.bf16.mxu1 %v1282_v0 }
 0x2a9   :  { %1042 = vmatpush3.bf16.msra.mxu1 %v1161_v1 }
 0x2aa   :  { %1043 = vmatprep.subr.bf16.mxu1 %v1282_v0 }
 0x2ad   :  { %1044 = vmatpush3.bf16.msra.mxu1 %v1162_v2 }
 0x2ae   :  { %1045 = vmatprep.subr.bf16.mxu1 %v1282_v0 }
 0x2b1   :  { %1046 = vmatpush3.bf16.msra.mxu1 %v1163_v3 }
 0x2b2   :  { %1047 = vmatprep.subr.bf16.mxu1 %v1282_v0 }
 0x2b5   :  { %1048 = vmatpush3.bf16.msra.mxu1 %v1164_v4 }
 0x2b6   :  { %1049 = vmatprep.subr.bf16.mxu1 %v1282_v0 }
 0x2b9   :  { %1050 = vmatpush3.bf16.msra.mxu1 %v1165_v5 }
 0x2ba   :  { %1051 = vmatprep.subr.bf16.mxu1 %v1282_v0  ;;  %v986_v0 = vld [vmem:[%s1441_s10] ss:$0 sm:$0xff] }
 0x2bd   :  { %1052 = vmatpush3.bf16.msra.mxu1 %v1166_v6 }
 0x360   :  { %v1014_v10 = vpop.f32.mrf.mxu1 }
 0x362   :  { %v1015_v11 = vpop.f32.mrf.mxu1 }
 0x363   :  { %v1016_v12 = vadd.f32 %v1015_v11, %v1014_v10 }
 0x364   :  { %v1017_v14 = vpop.f32.mrf.mxu1 }
 0x365   :  { %v787_v15 = vpack.c.bf16 %v1016_v12, %v1016_v12 }
 0x366   :  { %v1018_v16 = vpop.f32.mrf.mxu1 }
 0x367   :  { %v797_v17 = vadd.bf16 %v796_v13, %v787_v15 }
 0x369   :  { %v798_v18 = vmax.bf16 %v1284_v21, %v797_v17 }
 0x36b   :  { %1054 = vmatmul.mubr.bf16.vlgmr.msra.gmra.mxu1 %v798_v18 }
 0x42b   :  { %v904_v19 = vpop.f32.mrf.mxu1 }
 0x42c   :  { %v905_v20 = vadd.f32 %v986_v0, %v904_v19 }
 0x42d   :  { %v1055_v22 = vpop.f32.mrf.mxu1 }
 0x42e   :  { %v910_v23 = vpack.c.bf16 %v905_v20, %v905_v20 }
 0x42f   :  { %v907_v24 = vpop.f32.mrf.mxu1 }
 0x430   :  { %911 = vst [vmem:[%s1442_s11] sm:$0xf] %v910_v23 }
 0x431   :  { %v1056_v55 = vpop.f32.mrf.mxu1 }
 0x432   :  { %916 = vsyncpa [#allocation3], 1 }
 0x433   :  { %917 = vsyncpa [#allocation5], 1 }
 0x434   :  { %918 = vsyncpa [#allocation8], 1 }

</bundles_post_ra>
